<compile_context>
chip_gen: v5e
topology: v5e:2x2
jax: 0.10.0
libtpu: 0.0.40
codegen_flags: <defaults>
</compile_context>

<pallas_src>
import jax
import jax.numpy as jnp
from jax.experimental import pallas as pl
from jax.experimental.pallas import tpu as pltpu


def bilstm_step_kernel(x_ref, h_ref, wx_ref, wh_ref, b_ref, who_ref, bho_ref,
                       logp_ref, hcat_ref):
    """Fused bidirectional single-step LSTM (h0=c0=0) + h2o + log-softmax.

    Packed gate-column layout (width 6H): [i_f | i_b | g_f | g_b | o_f | o_b].
    """
    H2 = hcat_ref.shape[1]          # 2H
    cdt = wx_ref.dtype              # MXU operand dtype (f32 or bf16)

    x = x_ref[...].astype(cdt)      # (TB, E)
    h = h_ref[...].astype(cdt)      # (TB, 2H)

    # One fused gate matmul pair for both directions; forget gate dropped
    # because c0 == 0. Accumulate in f32, add the folded (b_ih + b_hh) bias.
    gates = (jnp.dot(x, wx_ref[...], preferred_element_type=jnp.float32)
             + jnp.dot(h, wh_ref[...], preferred_element_type=jnp.float32)
             + b_ref[...])                                    # (TB, 6H) f32

    i_all = jax.nn.sigmoid(gates[:, 0:H2])          # [i_f | i_b]
    g_all = jnp.tanh(gates[:, H2:2 * H2])           # [g_f | g_b]
    o_all = jax.nn.sigmoid(gates[:, 2 * H2:3 * H2])  # [o_f | o_b]
    h_all = o_all * jnp.tanh(i_all * g_all)         # (TB, 2H) == [h_f | h_b]
    hcat_ref[...] = h_all

    # h2o linear on the already-concatenated LSTM output, padded lane-dense.
    logits = (jnp.dot(h_all.astype(cdt), who_ref[...],
                      preferred_element_type=jnp.float32) + bho_ref[...])
    m = jnp.max(logits, axis=1, keepdims=True)
    lse = jnp.log(jnp.sum(jnp.exp(logits - m), axis=1, keepdims=True)) + m
    logp_ref[...] = logits - lse                    # padded cols ~ -1e30


def prepare_params(params, compute_dtype=jnp.float32):
    """One-time parameter packing (hoisted out of the per-step path)."""
    H = params["hidden_size"]
    E = params["embed_w"].shape[1]
    nsym = params["h2o_w"].shape[0]
    npad = ((nsym + 127) // 128) * 128              # lane-dense logits width
    assert E + 2 * H == params["w_ih_f"].shape[1]

    def igo(w_ih, b_ih, b_hh):
        # PyTorch gate order i, f, g, o; drop dead f gate (c0 == 0).
        b = b_ih + b_hh
        return ((w_ih[0:H], w_ih[2 * H:3 * H], w_ih[3 * H:4 * H]),
                (b[0:H], b[2 * H:3 * H], b[3 * H:4 * H]))

    (wi_f, wg_f, wo_f), (bi_f, bg_f, bo_f) = igo(
        params["w_ih_f"], params["b_ih_f"], params["b_hh_f"])
    (wi_b, wg_b, wo_b), (bi_b, bg_b, bo_b) = igo(
        params["w_ih_b"], params["b_ih_b"], params["b_hh_b"])

    # Column layout: [i_f | i_b | g_f | g_b | o_f | o_b], each block H wide.
    w_all = jnp.concatenate([wi_f, wi_b, wg_f, wg_b, wo_f, wo_b], axis=0)
    b_all = jnp.concatenate([bi_f, bi_b, bg_f, bg_b, bo_f, bo_b])

    wx = w_all[:, :E].T.astype(compute_dtype)        # (E, 6H)   x block
    wh = w_all[:, E:].T.astype(compute_dtype)        # (2H, 6H)  hidden block
    b = b_all.reshape(1, 6 * H).astype(jnp.float32)  # (1, 6H)   f32 bias

    # h2o, padded to a multiple of 128 output lanes; padded columns get zero
    # weight and -1e30 bias so the log-softmax ignores them exactly.
    who = jnp.zeros((2 * H, npad), compute_dtype).at[:, :nsym].set(
        params["h2o_w"].T.astype(compute_dtype))
    bho = jnp.full((1, npad), -1e30, jnp.float32).at[0, :nsym].set(
        params["h2o_b"].astype(jnp.float32))

    # Only arrays go in here (shape metadata is derived from array shapes so
    # the dict can be passed straight through jax.jit).
    return {"embed_w": params["embed_w"], "wx": wx, "wh": wh, "b": b,
            "who": who, "bho": bho}


def rnn_forward(input_x, hidden, prep):
    """Full module forward. Embedding gather + the PyTorch .view() quirk are
    XLA glue; the matmuls / gates / log-softmax run in the Pallas kernel."""
    B = input_x.shape[0]
    E = prep["wx"].shape[0]
    H = prep["wh"].shape[0] // 2
    npad = prep["who"].shape[1]
    nsym = prep["embed_w"].shape[0]

    x = jnp.take(prep["embed_w"], input_x, axis=0)   # (B, E) embedding gather

    # Batch tiling: one tile for small B, 256-row tiles (one full MXU pass on
    # v6e/v7x) for large B; the grid axis is "parallel" for v7x megacore.
    TB = 256 if (B % 256 == 0) else B
    grid = (B // TB,)

    logp_pad, h_cat = pl.pallas_call(
        bilstm_step_kernel,
        out_shape=(
            jax.ShapeDtypeStruct((B, npad), jnp.float32),
            jax.ShapeDtypeStruct((B, 2 * H), jnp.float32),
        ),
        grid=grid,
        in_specs=[
            pl.BlockSpec((TB, E), lambda i: (i, 0)),          # x
            pl.BlockSpec((TB, 2 * H), lambda i: (i, 0)),      # hidden
            pl.BlockSpec((E, 6 * H), lambda i: (0, 0)),       # Wx (resident)
            pl.BlockSpec((2 * H, 6 * H), lambda i: (0, 0)),   # Wh (resident)
            pl.BlockSpec((1, 6 * H), lambda i: (0, 0)),       # gate bias
            pl.BlockSpec((2 * H, npad), lambda i: (0, 0)),    # W_h2o^T padded
            pl.BlockSpec((1, npad), lambda i: (0, 0)),        # b_h2o padded
        ],
        out_specs=(
            pl.BlockSpec((TB, npad), lambda i: (i, 0)),       # log-probs
            pl.BlockSpec((TB, 2 * H), lambda i: (i, 0)),      # [h_f | h_b]
        ),
        compiler_params=pltpu.CompilerParams(
            dimension_semantics=("parallel",)),
        # NOTE: at large H on v7x (64 MiB VMEM) set vmem_limit_bytes and/or
        # keep compute_dtype=bf16; at these shapes the default limit is ample.
    )(x, hidden, prep["wx"], prep["wh"], prep["b"], prep["who"], prep["bho"])

    logp = logp_pad[:, :nsym]
    # h_n has shape (2, B, H) in PyTorch; .view(B, -1) is a C-order reshape
    # (deliberately reproduced, including its batch interleaving).
    h_f, h_b = h_cat[:, :H], h_cat[:, H:]
    hidden_out = jnp.stack([h_f, h_b], axis=0).reshape(B, 2 * H)
    return logp, hidden_out


def init_params(key, nsymbols, hidden_size, embed_size):
    ks = jax.random.split(key, 8)
    H = hidden_size
    u = lambda k, shape, a: jax.random.uniform(k, shape, jnp.float32, -a, a)
    stdv = 1.0 / jnp.sqrt(H)
    return {
        "hidden_size": H,
        "embed_w": u(ks[0], (nsymbols, embed_size), 0.1),
        # LSTM (bidirectional, input_size = 3H): PyTorch gate order i,f,g,o.
        "w_ih_f": u(ks[1], (4 * H, 3 * H), stdv),
        "b_ih_f": u(ks[2], (4 * H,), stdv),
        "b_hh_f": u(ks[3], (4 * H,), stdv),
        "w_ih_b": u(ks[4], (4 * H, 3 * H), stdv),
        "b_ih_b": u(ks[5], (4 * H,), stdv),
        "b_hh_b": u(ks[6], (4 * H,), stdv),
        # h2o: weight uniform(-0.1, 0.1), bias zeros (init_weights()).
        "h2o_w": u(ks[7], (nsymbols, 2 * H), 0.1),
        "h2o_b": jnp.zeros((nsymbols,), jnp.float32),
    }


def _reference(input_x, hidden, params):
    """Pure-JAX reference for a numerical sanity check."""
    H = params["hidden_size"]
    x = jnp.take(params["embed_w"], input_x, axis=0)
    comb = jnp.concatenate([x, hidden], axis=1)

    def direction(w, b_ih, b_hh):
        g = comb @ w.T + b_ih + b_hh
        i, f, gg, o = jnp.split(g, 4, axis=1)
        c = jax.nn.sigmoid(i) * jnp.tanh(gg)          # f * c0 == 0
        return jax.nn.sigmoid(o) * jnp.tanh(c)

    h_f = direction(params["w_ih_f"], params["b_ih_f"], params["b_hh_f"])
    h_b = direction(params["w_ih_b"], params["b_ih_b"], params["b_hh_b"])
    out = jnp.concatenate([h_f, h_b], axis=1)
    logits = out @ params["h2o_w"].T + params["h2o_b"]
    logp = jax.nn.log_softmax(logits, axis=1)
    hidden_out = jnp.stack([h_f, h_b], axis=0).reshape(input_x.shape[0], 2 * H)
    return logp, hidden_out


if __name__ == "__main__":
    # Small shapes consistent with the module: embed_size == hidden_size.
    nsymbols, hidden_size, embed_size, batch = 16, 32, 32, 8

    key = jax.random.PRNGKey(0)
    kp, kx, kh = jax.random.split(key, 3)
    params = init_params(kp, nsymbols, hidden_size, embed_size)

    input_x = jax.random.randint(kx, (batch,), 0, nsymbols, dtype=jnp.int32)
    hidden = jax.random.uniform(kh, (batch, 2 * hidden_size), jnp.float32,
                                -0.5, 0.5)

    ref_logp, ref_hidden = _reference(input_x, hidden, params)
    fwd = jax.jit(rnn_forward)

    # f32 MXU operands: exact check (v5e-friendly path).
    prep32 = prepare_params(params, compute_dtype=jnp.float32)
    logp, hidden_out = fwd(input_x, hidden, prep32)
    jax.block_until_ready((logp, hidden_out))
    assert jnp.allclose(logp, ref_logp, atol=1e-5, rtol=1e-5)
    assert jnp.allclose(hidden_out, ref_hidden, atol=1e-5, rtol=1e-5)

    # bf16 MXU operands, f32 accumulation/activations (v6e/v7x preferred).
    prep16 = prepare_params(params, compute_dtype=jnp.bfloat16)
    logp16, hidden16 = fwd(input_x, hidden, prep16)
    jax.block_until_ready((logp16, hidden16))
    assert jnp.allclose(logp16, ref_logp, atol=1e-1, rtol=1e-1)
    assert jnp.allclose(hidden16, ref_hidden, atol=1e-1, rtol=1e-1)

    print("KERNEL_OK")
</pallas_src>

<mosaic_0001>
module attributes {stable_mosaic.version = 11 : i64} {
  func.func @bilstm_step_kernel(%arg0: i32, %arg1: memref<8x32xf32, #tpu.memory_space<vmem>>, %arg2: memref<8x64xf32, #tpu.memory_space<vmem>>, %arg3: memref<32x192xf32, #tpu.memory_space<vmem>>, %arg4: memref<64x192xf32, #tpu.memory_space<vmem>>, %arg5: memref<1x192xf32, #tpu.memory_space<vmem>>, %arg6: memref<64x128xf32, #tpu.memory_space<vmem>>, %arg7: memref<1x128xf32, #tpu.memory_space<vmem>>, %arg8: memref<8x128xf32, #tpu.memory_space<vmem>>, %arg9: memref<8x64xf32, #tpu.memory_space<vmem>>) attributes {dimension_semantics = [#tpu.dimension_semantics<parallel>], iteration_bounds = array<i64: 1>, scalar_prefetch = 0 : i64, scratch_operands = 0 : i64, tpu.core_type = #tpu.core_type<tc>, window_params = [{transform_indices = @transform_0, window_bounds = array<i64: 8, 32>}, {transform_indices = @transform_1, window_bounds = array<i64: 8, 64>}, {pipeline_mode = #tpu.pipeline_mode<synchronous>, transform_indices = @transform_2, window_bounds = array<i64: 32, 192>}, {pipeline_mode = #tpu.pipeline_mode<synchronous>, transform_indices = @transform_3, window_bounds = array<i64: 64, 192>}, {pipeline_mode = #tpu.pipeline_mode<synchronous>, transform_indices = @transform_4, window_bounds = array<i64: 1, 192>}, {pipeline_mode = #tpu.pipeline_mode<synchronous>, transform_indices = @transform_5, window_bounds = array<i64: 64, 128>}, {pipeline_mode = #tpu.pipeline_mode<synchronous>, transform_indices = @transform_6, window_bounds = array<i64: 1, 128>}, {transform_indices = @transform_7, window_bounds = array<i64: 8, 128>}, {transform_indices = @transform_8, window_bounds = array<i64: 8, 64>}]} {
    %c0 = arith.constant 0 : index
    %c0_0 = arith.constant 0 : index
    %0 = vector.load %arg1[%c0, %c0_0] : memref<8x32xf32, #tpu.memory_space<vmem>>, vector<8x32xf32>
    %c0_1 = arith.constant 0 : index
    %c0_2 = arith.constant 0 : index
    %1 = vector.load %arg2[%c0_1, %c0_2] : memref<8x64xf32, #tpu.memory_space<vmem>>, vector<8x64xf32>
    %c0_3 = arith.constant 0 : index
    %c0_4 = arith.constant 0 : index
    %2 = vector.load %arg3[%c0_3, %c0_4] : memref<32x192xf32, #tpu.memory_space<vmem>>, vector<32x192xf32>
    %cst = arith.constant dense<0.000000e+00> : vector<8x192xf32>
    %3 = tpu.matmul %0, %2, %cst {dimension_numbers = #tpu.dot_dimension_numbers<[1], [0], [0], [1], [0, 0, 1, 1], [], []>} : vector<8x32xf32>, vector<32x192xf32>, vector<8x192xf32> -> vector<8x192xf32>
    %c0_5 = arith.constant 0 : index
    %c0_6 = arith.constant 0 : index
    %4 = vector.load %arg4[%c0_5, %c0_6] : memref<64x192xf32, #tpu.memory_space<vmem>>, vector<64x192xf32>
    %cst_7 = arith.constant dense<0.000000e+00> : vector<8x192xf32>
    %5 = tpu.matmul %1, %4, %cst_7 {dimension_numbers = #tpu.dot_dimension_numbers<[1], [0], [0], [1], [0, 0, 1, 1], [], []>} : vector<8x64xf32>, vector<64x192xf32>, vector<8x192xf32> -> vector<8x192xf32>
    %6 = arith.addf %3, %5 : vector<8x192xf32>
    %c0_8 = arith.constant 0 : index
    %c0_9 = arith.constant 0 : index
    %7 = vector.load %arg5[%c0_8, %c0_9] : memref<1x192xf32, #tpu.memory_space<vmem>>, vector<1x192xf32>
    %8 = vector.broadcast %7 : vector<1x192xf32> to vector<8x192xf32>
    %9 = arith.addf %6, %8 : vector<8x192xf32>
    %10 = vector.extract_strided_slice %9 {offsets = [0, 0], sizes = [8, 64], strides = [1, 1]} : vector<8x192xf32> to vector<8x64xf32>
    %11 = arith.negf %10 : vector<8x64xf32>
    %12 = math.exp %11 : vector<8x64xf32>
    %cst_10 = arith.constant 1.000000e+00 : f32
    %13 = vector.broadcast %cst_10 : f32 to vector<8x64xf32>
    %14 = arith.addf %13, %12 : vector<8x64xf32>
    %15 = arith.divf %13, %14 : vector<8x64xf32>
    %16 = vector.extract_strided_slice %9 {offsets = [0, 64], sizes = [8, 64], strides = [1, 1]} : vector<8x192xf32> to vector<8x64xf32>
    %17 = math.tanh %16 : vector<8x64xf32>
    %18 = vector.extract_strided_slice %9 {offsets = [0, 128], sizes = [8, 64], strides = [1, 1]} : vector<8x192xf32> to vector<8x64xf32>
    %19 = arith.negf %18 : vector<8x64xf32>
    %20 = math.exp %19 : vector<8x64xf32>
    %cst_11 = arith.constant 1.000000e+00 : f32
    %21 = vector.broadcast %cst_11 : f32 to vector<8x64xf32>
    %22 = arith.addf %21, %20 : vector<8x64xf32>
    %23 = arith.divf %21, %22 : vector<8x64xf32>
    %24 = arith.mulf %15, %17 : vector<8x64xf32>
    %25 = math.tanh %24 : vector<8x64xf32>
    %26 = arith.mulf %23, %25 : vector<8x64xf32>
    %c0_12 = arith.constant 0 : index
    %c0_13 = arith.constant 0 : index
    %27 = vector.load %arg9[%c0_12, %c0_13] : memref<8x64xf32, #tpu.memory_space<vmem>>, vector<8x64xf32>
    tpu.vector_store %arg9[%c0_12, %c0_13], %26 {strides = array<i32>} : memref<8x64xf32, #tpu.memory_space<vmem>>, vector<8x64xf32>,
    %c0_14 = arith.constant 0 : index
    %c0_15 = arith.constant 0 : index
    %28 = vector.load %arg6[%c0_14, %c0_15] : memref<64x128xf32, #tpu.memory_space<vmem>>, vector<64x128xf32>
    %cst_16 = arith.constant dense<0.000000e+00> : vector<8x128xf32>
    %29 = tpu.matmul %26, %28, %cst_16 {dimension_numbers = #tpu.dot_dimension_numbers<[1], [0], [0], [1], [0, 0, 1, 1], [], []>} : vector<8x64xf32>, vector<64x128xf32>, vector<8x128xf32> -> vector<8x128xf32>
    %c0_17 = arith.constant 0 : index
    %c0_18 = arith.constant 0 : index
    %30 = vector.load %arg7[%c0_17, %c0_18] : memref<1x128xf32, #tpu.memory_space<vmem>>, vector<1x128xf32>
    %31 = vector.broadcast %30 : vector<1x128xf32> to vector<8x128xf32>
    %32 = arith.addf %29, %31 : vector<8x128xf32>
    %cst_19 = arith.constant dense<0xFF800000> : vector<8xf32>
    %33 = vector.multi_reduction <maximumf>, %32, %cst_19 [1] : vector<8x128xf32> to vector<8xf32>
    %34 = vector.shape_cast %33 : vector<8xf32> to vector<8x1xf32>
    %35 = vector.broadcast %34 : vector<8x1xf32> to vector<8x128xf32>
    %36 = arith.subf %32, %35 : vector<8x128xf32>
    %37 = math.exp %36 : vector<8x128xf32>
    %cst_20 = arith.constant dense<0.000000e+00> : vector<8xf32>
    %38 = vector.multi_reduction <add>, %37, %cst_20 [1] : vector<8x128xf32> to vector<8xf32>
    %39 = vector.shape_cast %38 : vector<8xf32> to vector<8x1xf32>
    %40 = math.log %39 : vector<8x1xf32>
    %41 = arith.addf %40, %34 : vector<8x1xf32>
    %42 = vector.broadcast %41 : vector<8x1xf32> to vector<8x128xf32>
    %43 = arith.subf %32, %42 : vector<8x128xf32>
    %c0_21 = arith.constant 0 : index
    %c0_22 = arith.constant 0 : index
    %44 = vector.load %arg8[%c0_21, %c0_22] : memref<8x128xf32, #tpu.memory_space<vmem>>, vector<8x128xf32>
    tpu.vector_store %arg8[%c0_21, %c0_22], %43 {strides = array<i32>} : memref<8x128xf32, #tpu.memory_space<vmem>>, vector<8x128xf32>,
    return
  }
  func.func @transform_0(%arg0: i32) -> (i32, i32) {
    %c0_i32 = arith.constant 0 : i32
    %c0_i32_0 = arith.constant 0 : i32
    return %arg0, %c0_i32 : i32, i32
  }
  func.func @transform_1(%arg0: i32) -> (i32, i32) {
    %c0_i32 = arith.constant 0 : i32
    %c0_i32_0 = arith.constant 0 : i32
    return %arg0, %c0_i32 : i32, i32
  }
  func.func @transform_2(%arg0: i32) -> (i32, i32) {
    %c0_i32 = arith.constant 0 : i32
    %c0_i32_0 = arith.constant 0 : i32
    %c0_i32_1 = arith.constant 0 : i32
    return %c0_i32, %c0_i32_0 : i32, i32
  }
  func.func @transform_3(%arg0: i32) -> (i32, i32) {
    %c0_i32 = arith.constant 0 : i32
    %c0_i32_0 = arith.constant 0 : i32
    %c0_i32_1 = arith.constant 0 : i32
    return %c0_i32, %c0_i32_0 : i32, i32
  }
  func.func @transform_4(%arg0: i32) -> (i32, i32) {
    %c0_i32 = arith.constant 0 : i32
    %c0_i32_0 = arith.constant 0 : i32
    %c0_i32_1 = arith.constant 0 : i32
    return %c0_i32, %c0_i32_0 : i32, i32
  }
  func.func @transform_5(%arg0: i32) -> (i32, i32) {
    %c0_i32 = arith.constant 0 : i32
    %c0_i32_0 = arith.constant 0 : i32
    %c0_i32_1 = arith.constant 0 : i32
    return %c0_i32, %c0_i32_0 : i32, i32
  }
  func.func @transform_6(%arg0: i32) -> (i32, i32) {
    %c0_i32 = arith.constant 0 : i32
    %c0_i32_0 = arith.constant 0 : i32
    %c0_i32_1 = arith.constant 0 : i32
    return %c0_i32, %c0_i32_0 : i32, i32
  }
  func.func @transform_7(%arg0: i32) -> (i32, i32) {
    %c0_i32 = arith.constant 0 : i32
    %c0_i32_0 = arith.constant 0 : i32
    return %arg0, %c0_i32 : i32, i32
  }
  func.func @transform_8(%arg0: i32) -> (i32, i32) {
    %c0_i32 = arith.constant 0 : i32
    %c0_i32_0 = arith.constant 0 : i32
    return %arg0, %c0_i32 : i32, i32
  }
}

</mosaic_0001>

<bundles_post_ra>
// kernel: rnn_forward.1
= control target key start
LH: loop header
LB: loop body
LE: loop exit
PB: predicated region body
PF: predicated region fallthrough
CT: control target
= control target key end

     0   :  { %14 = vsyncpa [#allocation3], 0  ;;  %s516_s0 = inlined_call_operand.vmem [shape: f32[8,32], index: 0, kind: input, shape index: {}]   ;;  %s517_s1 = inlined_call_operand.vmem [shape: f32[8,64], index: 1, kind: input, shape index: {}]   ;;  %s518_s2 = inlined_call_operand.vmem [shape: f32[32,192], index: 2, kind: input, shape index: {}]   ;;  %s519_s3 = inlined_call_operand.hbm [shape: f32[64,192], index: 3, kind: input, shape index: {}]   ;;  %s520_s4 = inlined_call_operand.vmem [shape: f32[1,192], index: 4, kind: input, shape index: {}]   ;;  %s521_s5 = inlined_call_operand.hbm [shape: f32[64,128], index: 5, kind: input, shape index: {}]   ;;  %s522_s6 = inlined_call_operand.vmem [shape: f32[1,128], index: 6, kind: input, shape index: {}]   ;;  %s523_s7 = inlined_call_operand.hbm [shape: f32[8,128], index: 7, kind: output, shape index: {0}]   ;;  %s524_s8 = inlined_call_operand.vmem [shape: f32[8,64], index: 8, kind: output, shape index: {1}]  }
   0x1   :  { %15 = vsyncpa [#allocation6], 0 }
   0x2   :  { %16 = vsyncpa [#allocation4], 0  ;;  %s27_s29 = sshll.u32 %s519_s3, 4  ;;  %s409_s30 = smov [#allocation2]   ;;  %s28_s29 = int_to_ptr.hbm [resolvable:$true] %s27_s29 }
   0x3   :  { %s29_s9 = sshll.u32 %s409_s30, 4  ;;  %s42_s12 = sshll.u32 %s521_s5, 4  ;;  %s30_s9 = int_to_ptr.vmem [resolvable:$true] %s29_s9  ;;  %s43_s12 = int_to_ptr.hbm [resolvable:$true] %s42_s12 }
   0x4   :  { %s410_s13 = smov 256   ;;  %s411_s14 = smov 16  }
   0x5   :  { %35 = dma.hbm_to_vmem [thread:$0]  %s28_s29, 2048, %s30_s9, [#allocation3], %s410_s13, %s410_s13, %s411_s14  }
   0x6   :  { %s412_s15 = smov [#allocation5]   ;;  %s413_s17 = smov 128  }
   0x7   :  { %s44_s16 = sshll.u32 %s412_s15, 4  ;;  %s414_s18 = smov 8   ;;  %s45_s16 = int_to_ptr.vmem [resolvable:$true] %s44_s16 }
   0x8   :  { %50 = dma.hbm_to_vmem [thread:$0]  %s43_s12, 1024, %s45_s16, [#allocation6], %s413_s17, %s413_s17, %s414_s18  }
   0x9   :  { %403 = dma.done.wait [#allocation3], 2048  }
   0xa   :  { %404 = vsyncadd [#allocation3], 4294965248 }
   0xb   :  { %405 = dma.done.wait [#allocation6], 1024  }
   0xc   :  { %406 = vsyncadd [#allocation6], 4294966272  ;;  %v85_v0 = vld [vmem:[#allocation2 + $0x70] sm:$0xff]  ;;  %v83_v1 = vld [vmem:[#allocation2 + $0x60] sm:$0xff]  ;;  %vm131_vm0 = vcmask 261120   ;;  %vm87_vm1 = vcmask 523264  }
   0xd   :  { %v69_v2 = vld [vmem:[%s518_s2 + $0x30] sm:$0xff]  ;;  %99 = vmatpush.msra.mxu0 %v85_v0  ;;  %v67_v3 = vld [vmem:[%s518_s2 + $0x20] sm:$0xff]  ;;  %v86_v8 = vld [vmem:[#allocation2 + $0x78] sm:$0xff]  ;;  %s415_s14 = smov 64   ;;  %s284_s5 = sshll.u32 %s523_s7, 4  ;;  %s285_s5 = int_to_ptr.hbm [resolvable:$true] %s284_s5 }
   0xe   :  { %147 = vmatpush.msra.mxu3 %v69_v2  ;;  %v81_v4 = vld [vmem:[#allocation2 + $0x50] sm:$0xff]  ;;  %v79_v6 = vld [vmem:[#allocation2 + $0x40] sm:$0xff]  ;;  %v84_v10 = vld [vmem:[#allocation2 + $0x68] sm:$0xff]  ;;  %119 = vmatpush.msra.mxu1 %v86_v8 }
   0xf   :  { %v65_v5 = vld [vmem:[%s518_s2 + $0x10] sm:$0xff]  ;;  %100 = vmatpush.msra.mxu0 %v83_v1  ;;  %v63_v7 = vld [vmem:[%s518_s2] sm:$0xff]  ;;  %v70_v12 = vld [vmem:[%s518_s2 + $0x38] sm:$0xff] }
  0x10   :  { %148 = vmatpush.msra.mxu3 %v67_v3  ;;  %v61_v9 = vld [vmem:[%s516_s0] sm:$0xff]  ;;  %v77_v11 = vld [vmem:[#allocation2 + $0x30] sm:$0xff]  ;;  %v82_v13 = vld [vmem:[#allocation2 + $0x58] sm:$0xff]  ;;  %120 = vmatpush.msra.mxu1 %v84_v10 }
  0x11   :  { %101 = vmatpush.msra.mxu0 %v81_v4  ;;  %v75_v14 = vld [vmem:[#allocation2 + $0x20] sm:$0xff]  ;;  %v68_v15 = vld [vmem:[%s518_s2 + $0x28] sm:$0xff]  ;;  %v73_v17 = vld [vmem:[#allocation2 + $0x10] sm:$0xff] }
  0x12   :  { %149 = vmatpush.msra.mxu3 %v65_v5  ;;  %v80_v16 = vld [vmem:[#allocation2 + $0x48] sm:$0xff]  ;;  %121 = vmatpush.msra.mxu1 %v82_v13  ;;  %v66_v18 = vld [vmem:[%s518_s2 + $0x18] sm:$0xff]  ;;  %v71_v20 = vld [vmem:[#allocation2] sm:$0xff] }
  0x13   :  { %102 = vmatpush.msra.mxu0 %v79_v6  ;;  %v78_v19 = vld [vmem:[#allocation2 + $0x38] sm:$0xff]  ;;  %v64_v21 = vld [vmem:[%s518_s2 + $0x8] sm:$0xff]  ;;  %v62_v22 = vld [vmem:[%s517_s1] sm:$0xff] }
  0x14   :  { %150 = vmatpush.msra.mxu3 %v63_v7  ;;  %122 = vmatpush.msra.mxu1 %v80_v16  ;;  %v76_v23 = vld [vmem:[#allocation2 + $0x28] sm:$0xff]  ;;  %v74_v24 = vld [vmem:[#allocation2 + $0x18] sm:$0xff]  ;;  %v236_v27 = vld [vmem:[#allocation5 + $0x30] sm:$0xff] }
  0x15   :  { %301 = vmatmul.msk.f32.vlgmr.msra.gmra.mxu3 %vm131_vm0, %v61_v9  ;;  %103 = vmatpush.msra.mxu0 %v77_v11  ;;  %v72_v25 = vld [vmem:[#allocation2 + $0x8] sm:$0xff]  ;;  %v237_v26 = vld [vmem:[#allocation5 + $0x38] sm:$0xff]  ;;  %v175_v28 = vld [vmem:[%s520_s4] sm:$0x3] }
  0x16   :  { %167 = vmatpush.msrb.mxu3 %v70_v12  ;;  %123 = vmatpush.msra.mxu1 %v78_v19  ;;  %v177_v30 = vperm.slane %v175_v28, 0  ;;  %v178_v39 = vperm.slane %v175_v28, 1  ;;  %v235_v44 = vld [vmem:[#allocation5 + $0x28] sm:$0xff]  ;;  %v234_v45 = vld [vmem:[#allocation5 + $0x20] sm:$0xff]  ;;  %v233_v46 = vld [vmem:[#allocation5 + $0x18] sm:$0xff] }
  0x17   :  { %104 = vmatpush.msra.mxu0 %v75_v14  ;;  %253 = vmatpush.msra.mxu2 %v237_v26  ;;  %v232_v47 = vld [vmem:[#allocation5 + $0x10] sm:$0xff]  ;;  %v231_v49 = vld [vmem:[#allocation5 + $0x8] sm:$0xff]  ;;  %v230_v50 = vld [vmem:[#allocation5] sm:$0xff] }
  0x18   :  { %168 = vmatpush.msrb.mxu3 %v68_v15  ;;  %124 = vmatpush.msra.mxu1 %v76_v23  ;;  %v314_v12 = vld [vmem:[%s522_s6] ss:$0 sm:$0xff] }
  0x19   :  { %105 = vmatpush.msra.mxu0 %v73_v17  ;;  %254 = vmatpush.msra.mxu2 %v236_v27 }
  0x1a   :  { %169 = vmatpush.msrb.mxu3 %v66_v18  ;;  %125 = vmatpush.msra.mxu1 %v74_v24 }
  0x1b   :  { %106 = vmatpush.msra.mxu0 %v71_v20  ;;  %255 = vmatpush.msra.mxu2 %v235_v44 }
  0x1c   :  { %170 = vmatpush.msrb.mxu3 %v64_v21  ;;  %299 = vmatmul.msk.f32.vlgmr.msra.gmra.mxu0 %vm87_vm1, %v62_v22 }
  0x1d   :  { %302 = vmatmul.msk.f32.vlgmr.msrb.gmra.mxu3 %vm131_vm0, %v61_v9  ;;  %126 = vmatpush.msra.mxu1 %v72_v25 }
  0x1e   :  { %300 = vmatmul.msk.f32.vlgmr.msra.gmra.mxu1 %vm87_vm1, %v62_v22  ;;  %256 = vmatpush.msra.mxu2 %v234_v45 }
  0x20   :  { %257 = vmatpush.msra.mxu2 %v233_v46 }
  0x22   :  { %258 = vmatpush.msra.mxu2 %v232_v47 }
  0x24   :  { %259 = vmatpush.msra.mxu2 %v231_v49 }
  0x26   :  { %260 = vmatpush.msra.mxu2 %v230_v50 }
  0x98   :  { %v152_v29 = vpop.f32.mrf.mxu3 }
  0x99   :  { %v108_v31 = vpop.f32.mrf.mxu0 }
  0x9a   :  { %v153_v32 = vadd.f32 %v152_v29, %v108_v31 }
  0x9b   :  { %v128_v35 = vpop.f32.mrf.mxu1 }
  0x9c   :  { %v181_v33 = vadd.f32 %v177_v30, %v153_v32 }
  0x9e   :  { %315 = vtanh.f32 %v181_v33  ;;  %v303_v37 = vmul.f32 -1.442695, %v181_v33 }
  0xa0   :  { %v172_v36 = vpop.f32.mrf.mxu3  ;;  %317 = vpow2.f32 %v303_v37 }
  0xa1   :  { %v173_v38 = vadd.f32 %v172_v36, %v128_v35 }
  0xa3   :  { %v182_v40 = vadd.f32 %v178_v39, %v173_v38 }
  0xa4   :  { %v316_v34 = vpop.eup %315 }
  0xa5   :  { %223 = vrot.lane.b32.xlu0 %v316_v34, %s415_s14  ;;  %v304_v41 = vmul.f32 -1.442695, %v182_v40 }
  0xa6   :  { %v318_v42 = vpop.eup %317 }
  0xa7   :  { %v186_v43 = vadd.f32 1.0, %v318_v42  ;;  %319 = vpow2.f32 %v304_v41 }
  0xa9   :  { %321 = vrcp.f32 %v186_v43  ;;  %v198_v59 = vand.u32 2147483648, %v186_v43  ;;  %vm192_vm3 = vweird.f32 %v186_v43  ;;  %v196_v61 = vand.u32 2147483647, %v186_v43 }
  0xab   :  { %v199_v63 = vor.u32 1.1754944e-38, %v198_v59  ;;  %vm197_vm5 = vcmp.eq.f32.partialorder %v196_v61, 8.507059e+37 }
  0xad   :  { %v320_v48 = vpop.eup %319 }
  0xae   :  { %v206_v51 = vadd.f32 1.0, %v320_v48 }
  0xaf   :  { %v322_v52 = vpop.eup %321 }
  0xb0   :  { %323 = vrcp.f32 %v206_v51  ;;  %v188_v53 = vmul.f32 %v322_v52, %v186_v43  ;;  %vm193_vm2 = vweird.f32 %v322_v52  ;;  %vm212_vm6 = vweird.f32 %v206_v51 }
  0xb1   :  { %vm194_vm4 = vmor %vm192_vm3, %vm193_vm2  ;;  %v218_v4 = vand.u32 2147483648, %v206_v51  ;;  %v216_v6 = vand.u32 2147483647, %v206_v51 }
  0xb2   :  { %v189_v54 = vsub.f32 1.0, %v188_v53 }
  0xb3   :  { %v219_v7 = vor.u32 1.1754944e-38, %v218_v4  ;;  %vm217_vm9 = vcmp.eq.f32.partialorder %v216_v6, 8.507059e+37 }
  0xb4   :  { %v190_v56 = vmul.f32 %v322_v52, %v189_v54 }
  0xb6   :  { %v324_v55 = vpop.eup %323  ;;  %v191_v58 = vadd.f32 %v322_v52, %v190_v56 }
  0xb7   :  { %v208_v57 = vmul.f32 %v324_v55, %v206_v51  ;;  %vm213_vm7 = vweird.f32 %v324_v55 }
  0xb8   :  { %v195_v62 = vsel %vm194_vm4, %v322_v52, %v191_v58  ;;  %vm214_vm8 = vmor %vm212_vm6, %vm213_vm7 }
  0xb9   :  { %v209_v60 = vsub.f32 1.0, %v208_v57  ;;  %v200_v2 = vsel %vm197_vm5, %v199_v63, %v195_v62 }
  0xbb   :  { %v210_v0 = vmul.f32 %v324_v55, %v209_v60 }
  0xbd   :  { %v211_v5 = vadd.f32 %v324_v55, %v210_v0 }
  0xbf   :  { %v215_v8 = vsel %vm214_vm8, %v324_v55, %v211_v5 }
  0xc0   :  { %v220_v10 = vsel %vm217_vm9, %v219_v7, %v215_v8 }
 0x117   :  { %v224_v1 = vpop.permute.xlu0 %223 }
 0x118   :  { %v226_v3 = vmul.f32 %v224_v1, %v200_v2 }
 0x11a   :  { %325 = vtanh.f32 %v226_v3 }
 0x120   :  { %v326_v9 = vpop.eup %325 }
 0x121   :  { %v228_v11 = vmul.f32 %v326_v9, %v220_v10 }
 0x123   :  { %229 = vst.msk [vmem:[%s524_s8] sm:$0xff] %vm87_vm1, %v228_v11  ;;  %305 = vmatmul.msk.f32.vlgmr.msra.gmra.mxu2 %vm87_vm1, %v228_v11  ;;  %s416_s8 = smov [#allocation7]  }
 0x124   :  { %s282_s18 = sshll.u32 %s416_s8, 4  ;;  %s283_s18 = int_to_ptr.vmem [resolvable:$true] %s282_s18 }
 0x1a6   :  { %v262_v13 = vpop.f32.mrf.mxu2 }
 0x1a7   :  { %v263_v14 = vadd.f32 %v314_v12, %v262_v13 }
 0x1a9   :  { %265 = vmax.xlane.f32.xlu0 %v263_v14 }
 0x21c   :  { %v266_v15 = vpop.xlane.xlu0 %265 }
 0x21d   :  { %v267_v16 = vsub.f32 %v263_v14, %v266_v15 }
 0x21f   :  { %v268_v17 = vmul.f32 1.442695, %v267_v16 }
 0x221   :  { %327 = vpow2.f32 %v268_v17 }
 0x227   :  { %v328_v18 = vpop.eup %327 }
 0x228   :  { %270 = vadd.xlane.f32.xlu1 %v328_v18 }
 0x29b   :  { %v271_v19 = vpop.xlane.xlu1 %270 }
 0x29c   :  { %329 = vlog2.f32 %v271_v19 }
 0x2a2   :  { %v330_v20 = vpop.eup %329 }
 0x2a3   :  { %v273_v21 = vmul.f32 0.6931472, %v330_v20 }
 0x2a5   :  { %v274_v22 = vadd.f32 %v273_v21, %v266_v15 }
 0x2a7   :  { %v275_v23 = vsub.f32 %v263_v14, %v274_v22 }
 0x2a9   :  { %276 = vst [vmem:[#allocation7] sm:$0xff] %v275_v23 }
 0x2aa   :  { %287 = dma.vmem_to_hbm [thread:$0]  %s283_s18, 128, %s285_s5, [#allocation4]  }
 0x2ab   :  { %407 = dma.done.wait [#allocation4], 128  }
 0x2ac   :  { %408 = vsyncadd [#allocation4], 4294967168 }
 0x2ad   :  { %296 = vsyncpa [#allocation3], 1 }
 0x2ae   :  { %297 = vsyncpa [#allocation6], 1 }
 0x2af   :  { %298 = vsyncpa [#allocation4], 1 }

</bundles_post_ra>
